<compile_context>
chip_gen: v5e
topology: v5e:2x2
jax: 0.10.0
libtpu: 0.0.40
codegen_flags: <defaults>
</compile_context>

<pallas_src>
import functools

import jax
import jax.numpy as jnp
from jax.experimental import pallas as pl
from jax.experimental.pallas import tpu as pltpu


def _temporal_block_kernel(*refs, kernel_size, dilation, has_downsample):
    if has_downsample:
        x_ref, w1_ref, b1_ref, w2_ref, b2_ref, wd_ref, bd_ref, o_ref = refs
    else:
        x_ref, w1_ref, b1_ref, w2_ref, b2_ref, o_ref = refs
        wd_ref = bd_ref = None

    K, d = kernel_size, dilation
    p = (K - 1) * d                      # causal history length == chomp size
    Lout = o_ref.shape[-1]               # lane-dense (multiple of 128)
    L1 = Lout + p                        # conv1 computed over t in [-p, Lout)

    # x block is (1, Cin, 2p + Lout): 2p zeros of causal history in front
    # (added by the wrapper), valid sequence, zero tail padding.
    x = x_ref[0]                         # (Cin, 2p + Lout), float32

    def fused_causal_conv(h, out_len, w_ref, b_ref):
        # Tap k of the causal dilated conv reads h[:, j + k*d] at output
        # position j; since h is already front-zero-padded these are static
        # lane-offset slices, and the K taps fuse into a single MXU matmul
        #   (Cout, K*C) @ (K*C, out_len)    (bf16 operands, f32 accumulate)
        stacked = jnp.concatenate(
            [h[:, k * d:k * d + out_len] for k in range(K)], axis=0)
        y = jnp.dot(w_ref[...], stacked.astype(w_ref.dtype),
                    preferred_element_type=jnp.float32)
        return y + b_ref[...]            # bias added once per conv (f32)

    # conv1 -> chomp -> ReLU -> dropout(identity), over [-p, Lout) so conv2
    # can tap its own causal history.
    h1 = jnp.maximum(fused_causal_conv(x, L1, w1_ref, b1_ref), 0.0)
    # Positions j < p correspond to t < 0: PyTorch's conv2 zero-pads there,
    # but the extended conv1 produced relu(b1); one select zeroes them.
    j_idx = jax.lax.broadcasted_iota(jnp.int32, (1, L1), 1)
    h1 = jnp.where(j_idx >= p, h1, 0.0)

    # conv2 -> chomp -> ReLU -> dropout(identity)
    h2 = jnp.maximum(fused_causal_conv(h1, Lout, w2_ref, b2_ref), 0.0)

    # Residual branch (1x1 conv when channel counts differ, identity else).
    x_now = x[:, 2 * p:2 * p + Lout]     # un-shifted x for t in [0, Lout)
    if has_downsample:
        res = (jnp.dot(wd_ref[...], x_now.astype(wd_ref.dtype),
                       preferred_element_type=jnp.float32)
               + bd_ref[...])
    else:
        res = x_now.astype(jnp.float32)  # requires Cin == Cout

    o_ref[0] = jnp.maximum(h2 + res, 0.0).astype(o_ref.dtype)


def temporal_block_forward(x_ncl, w1, b1, w2, b2, wd=None, bd=None, *,
                           dilation, matmul_dtype=jnp.bfloat16,
                           lane_tile=128):
    """TemporalBlock forward.

    x_ncl : (B, Cin, L) float32, PyTorch NCL layout.
    w1    : (Cout, Cin, K)  weight-normed conv1 weight (torch O,I,K layout).
    w2    : (Cout, Cout, K) weight-normed conv2 weight.
    wd    : (Cout, Cin) downsample 1x1 weight, or None when Cin == Cout.
    b1,b2,bd : (Cout,) biases.
    Returns (B, Cout, L) float32.
    """
    B, Cin, L = x_ncl.shape
    Cout, _, K = w1.shape
    has_downsample = wd is not None
    if not has_downsample:
        assert Cin == Cout, "identity residual requires n_inputs == n_outputs"

    p = (K - 1) * dilation
    Lout = pl.cdiv(L, lane_tile) * lane_tile      # lane-dense output width
    # TODO(synk): for very long sequences, tile L with a (K-1)*dilation halo
    # (and set pltpu.CompilerParams(vmem_limit_bytes=...)) so the working set
    # stays under v7x's 64 MiB VMEM; at these sizes one full-L block is fine.

    # Front pad = 2p zeros (causal history for conv1-of-conv2), tail pad to Lout.
    x_p = jnp.pad(x_ncl, ((0, 0), (0, 0), (2 * p, Lout - L))).astype(jnp.float32)
    Lx = Lout + 2 * p

    # Repack torch (O, I, K) weights into a single (O, K*I) matmul operand
    # whose contraction order matches the tap stacking inside the kernel.
    w1_flat = jnp.transpose(w1, (0, 2, 1)).reshape(Cout, K * Cin).astype(matmul_dtype)
    w2_flat = jnp.transpose(w2, (0, 2, 1)).reshape(Cout, K * Cout).astype(matmul_dtype)
    b1_c = b1.reshape(Cout, 1).astype(jnp.float32)
    b2_c = b2.reshape(Cout, 1).astype(jnp.float32)

    args = [x_p, w1_flat, b1_c, w2_flat, b2_c]
    in_specs = [
        pl.BlockSpec((1, Cin, Lx), lambda b: (b, 0, 0)),
        pl.BlockSpec((Cout, K * Cin), lambda b: (0, 0)),
        pl.BlockSpec((Cout, 1), lambda b: (0, 0)),
        pl.BlockSpec((Cout, K * Cout), lambda b: (0, 0)),
        pl.BlockSpec((Cout, 1), lambda b: (0, 0)),
    ]
    if has_downsample:
        args += [wd.astype(matmul_dtype),
                 bd.reshape(Cout, 1).astype(jnp.float32)]
        in_specs += [
            pl.BlockSpec((Cout, Cin), lambda b: (0, 0)),
            pl.BlockSpec((Cout, 1), lambda b: (0, 0)),
        ]

    kernel = functools.partial(
        _temporal_block_kernel, kernel_size=K, dilation=dilation,
        has_downsample=has_downsample)

    out_p = pl.pallas_call(
        kernel,
        out_shape=jax.ShapeDtypeStruct((B, Cout, Lout), jnp.float32),
        grid=(B,),
        in_specs=in_specs,
        out_specs=pl.BlockSpec((1, Cout, Lout), lambda b: (b, 0, 0)),
        compiler_params=pltpu.CompilerParams(
            dimension_semantics=("parallel",)),
    )(*args)
    return out_p[:, :, :L]


if __name__ == "__main__":
    # Module config: n_inputs=4, n_outputs=8, kernel_size=3, stride=1,
    # dilation=2, padding=(3-1)*2=4  (downsample present since 4 != 8).
    B, Cin, Cout, L = 2, 4, 8, 16
    K, dilation = 3, 2
    padding = (K - 1) * dilation

    key = jax.random.PRNGKey(0)
    ks = jax.random.split(key, 8)
    # Deterministic synthetic params (mirrors init_params: N(0, 0.01) weights).
    v1 = 0.01 * jax.random.normal(ks[0], (Cout, Cin, K), jnp.float32)     # torch (O,I,K)
    g1 = 1.0 + 0.1 * jax.random.normal(ks[1], (Cout,), jnp.float32)       # weight_norm gain
    b1 = 0.01 * jax.random.normal(ks[2], (Cout,), jnp.float32)
    v2 = 0.01 * jax.random.normal(ks[3], (Cout, Cout, K), jnp.float32)
    g2 = 1.0 + 0.1 * jax.random.normal(ks[4], (Cout,), jnp.float32)
    b2 = 0.01 * jax.random.normal(ks[5], (Cout,), jnp.float32)
    wd_t = 0.01 * jax.random.normal(ks[6], (Cout, Cin, 1), jnp.float32)   # downsample 1x1
    bd = 0.01 * jax.random.normal(ks[7], (Cout,), jnp.float32)
    x_ncl = jax.random.normal(jax.random.PRNGKey(42), (B, Cin, L), jnp.float32)

    def weight_norm(v, g):
        # weight_norm with dim=0: per-output-channel norm over (in, k).
        nrm = jnp.sqrt(jnp.sum(v * v, axis=(1, 2), keepdims=True))
        return g[:, None, None] * v / nrm

    w1_t = weight_norm(v1, g1)            # (Cout, Cin, K)
    w2_t = weight_norm(v2, g2)
    wd_k = wd_t[:, :, 0]                  # (Cout, Cin)

    out = temporal_block_forward(
        x_ncl, w1_t, b1, w2_t, b2, wd_k, bd, dilation=dilation)
    jax.block_until_ready(out)

    # --- references (PyTorch NCL conv semantics) ---
    def conv1d_ncl(x, w, b, d, p):
        y = jax.lax.conv_general_dilated(
            x, w, window_strides=(1,), padding=[(p, p)], rhs_dilation=(d,),
            dimension_numbers=("NCH", "OIH", "NCH"),
            precision=jax.lax.Precision.HIGHEST,
            preferred_element_type=jnp.float32)
        return y + b[None, :, None]

    def block_ref(x, w1_, w2_, wd3_, cast):
        h1 = jax.nn.relu(conv1d_ncl(x, w1_, b1, dilation, padding)[:, :, :-padding])
        h1 = cast(h1)
        h2 = jax.nn.relu(conv1d_ncl(h1, w2_, b2, dilation, padding)[:, :, :-padding])
        res = conv1d_ncl(x, wd3_, bd, 1, 0)
        return jax.nn.relu(h2 + res)

    q = lambda a: a.astype(jnp.bfloat16).astype(jnp.float32)   # bf16 rounding

    # (1) bf16-operand-consistent reference: same rounding points as the kernel
    #     (bf16 matmul operands, f32 accumulation) -> tight tolerance.
    ref_bf16 = block_ref(q(x_ncl), q(w1_t), q(w2_t), q(wd_t), q)
    # (2) full-f32 PyTorch-exact reference -> loose (bf16-level) tolerance.
    ref_f32 = block_ref(x_ncl, w1_t, w2_t, wd_t, lambda a: a)

    assert out.shape == (B, Cout, L)
    err_bf16 = float(jnp.max(jnp.abs(out - ref_bf16)))
    err_f32 = float(jnp.max(jnp.abs(out - ref_f32)))
    assert err_bf16 < 5e-3, f"bf16-consistent reference mismatch: {err_bf16}"
    assert err_f32 < 1e-1, f"f32 reference mismatch: {err_f32}"
    print("KERNEL_OK")
</pallas_src>

<mosaic_0001>
module attributes {stable_mosaic.version = 11 : i64} {
  func.func @_temporal_block_kernel(%arg0: i32, %arg1: memref<1x4x136xf32, #tpu.memory_space<vmem>>, %arg2: memref<8x12xbf16, #tpu.memory_space<vmem>>, %arg3: memref<8x1xf32, #tpu.memory_space<vmem>>, %arg4: memref<8x24xbf16, #tpu.memory_space<vmem>>, %arg5: memref<8x1xf32, #tpu.memory_space<vmem>>, %arg6: memref<8x4xbf16, #tpu.memory_space<vmem>>, %arg7: memref<8x1xf32, #tpu.memory_space<vmem>>, %arg8: memref<1x8x128xf32, #tpu.memory_space<vmem>>) attributes {dimension_semantics = [#tpu.dimension_semantics<parallel>], iteration_bounds = array<i64: 2>, scalar_prefetch = 0 : i64, scratch_operands = 0 : i64, tpu.core_type = #tpu.core_type<tc>, window_params = [{transform_indices = @transform_0, window_bounds = array<i64: 1, 4, 136>}, {pipeline_mode = #tpu.pipeline_mode<synchronous>, transform_indices = @transform_1, window_bounds = array<i64: 8, 12>}, {pipeline_mode = #tpu.pipeline_mode<synchronous>, transform_indices = @transform_2, window_bounds = array<i64: 8, 1>}, {pipeline_mode = #tpu.pipeline_mode<synchronous>, transform_indices = @transform_3, window_bounds = array<i64: 8, 24>}, {pipeline_mode = #tpu.pipeline_mode<synchronous>, transform_indices = @transform_4, window_bounds = array<i64: 8, 1>}, {pipeline_mode = #tpu.pipeline_mode<synchronous>, transform_indices = @transform_5, window_bounds = array<i64: 8, 4>}, {pipeline_mode = #tpu.pipeline_mode<synchronous>, transform_indices = @transform_6, window_bounds = array<i64: 8, 1>}, {transform_indices = @transform_7, window_bounds = array<i64: 1, 8, 128>}]} {
    %c0 = arith.constant 0 : index
    %c0_0 = arith.constant 0 : index
    %c0_1 = arith.constant 0 : index
    %0 = vector.load %arg1[%c0, %c0_0, %c0_1] : memref<1x4x136xf32, #tpu.memory_space<vmem>>, vector<1x4x136xf32>
    %1 = vector.shape_cast %0 : vector<1x4x136xf32> to vector<4x136xf32>
    %2 = vector.extract_strided_slice %1 {offsets = [0, 0], sizes = [4, 132], strides = [1, 1]} : vector<4x136xf32> to vector<4x132xf32>
    %3 = vector.extract_strided_slice %1 {offsets = [0, 2], sizes = [4, 132], strides = [1, 1]} : vector<4x136xf32> to vector<4x132xf32>
    %4 = vector.extract_strided_slice %1 {offsets = [0, 4], sizes = [4, 132], strides = [1, 1]} : vector<4x136xf32> to vector<4x132xf32>
    %5 = tpu.concatenate %2, %3, %4 in 0 : vector<4x132xf32>, vector<4x132xf32>, vector<4x132xf32> -> vector<12x132xf32>
    %c0_2 = arith.constant 0 : index
    %c0_3 = arith.constant 0 : index
    %6 = vector.load %arg2[%c0_2, %c0_3] : memref<8x12xbf16, #tpu.memory_space<vmem>>, vector<8x12xbf16>
    %7 = arith.truncf %5 : vector<12x132xf32> to vector<12x132xbf16>
    %cst = arith.constant dense<0.000000e+00> : vector<8x132xf32>
    %8 = tpu.matmul %6, %7, %cst {dimension_numbers = #tpu.dot_dimension_numbers<[1], [0], [0], [1], [0, 0, 1, 1], [], []>} : vector<8x12xbf16>, vector<12x132xbf16>, vector<8x132xf32> -> vector<8x132xf32>
    %c0_4 = arith.constant 0 : index
    %c0_5 = arith.constant 0 : index
    %9 = vector.load %arg3[%c0_4, %c0_5] : memref<8x1xf32, #tpu.memory_space<vmem>>, vector<8x1xf32>
    %10 = vector.broadcast %9 : vector<8x1xf32> to vector<8x132xf32>
    %11 = arith.addf %8, %10 : vector<8x132xf32>
    %cst_6 = arith.constant 0.000000e+00 : f32
    %12 = vector.broadcast %cst_6 : f32 to vector<8x132xf32>
    %13 = arith.maximumf %11, %12 : vector<8x132xf32>
    %14 = tpu.iota {dimensions = array<i32: 1>} : vector<1x132xi32>
    %c4_i32 = arith.constant 4 : i32
    %15 = vector.broadcast %c4_i32 : i32 to vector<1x132xi32>
    %16 = arith.cmpi sge, %14, %15 : vector<1x132xi32>
    %cst_7 = arith.constant 0.000000e+00 : f32
    %17 = vector.shape_cast %16 : vector<1x132xi1> to vector<1x132xi1>
    %18 = vector.broadcast %17 : vector<1x132xi1> to vector<8x132xi1>
    %19 = vector.broadcast %cst_7 : f32 to vector<8x132xf32>
    %20 = arith.select %18, %13, %19 : vector<8x132xi1>, vector<8x132xf32>
    %21 = vector.extract_strided_slice %20 {offsets = [0, 0], sizes = [8, 128], strides = [1, 1]} : vector<8x132xf32> to vector<8x128xf32>
    %22 = vector.extract_strided_slice %20 {offsets = [0, 2], sizes = [8, 128], strides = [1, 1]} : vector<8x132xf32> to vector<8x128xf32>
    %23 = vector.extract_strided_slice %20 {offsets = [0, 4], sizes = [8, 128], strides = [1, 1]} : vector<8x132xf32> to vector<8x128xf32>
    %24 = tpu.concatenate %21, %22, %23 in 0 : vector<8x128xf32>, vector<8x128xf32>, vector<8x128xf32> -> vector<24x128xf32>
    %c0_8 = arith.constant 0 : index
    %c0_9 = arith.constant 0 : index
    %25 = vector.load %arg4[%c0_8, %c0_9] : memref<8x24xbf16, #tpu.memory_space<vmem>>, vector<8x24xbf16>
    %26 = arith.truncf %24 : vector<24x128xf32> to vector<24x128xbf16>
    %cst_10 = arith.constant dense<0.000000e+00> : vector<8x128xf32>
    %27 = tpu.matmul %25, %26, %cst_10 {dimension_numbers = #tpu.dot_dimension_numbers<[1], [0], [0], [1], [0, 0, 1, 1], [], []>} : vector<8x24xbf16>, vector<24x128xbf16>, vector<8x128xf32> -> vector<8x128xf32>
    %c0_11 = arith.constant 0 : index
    %c0_12 = arith.constant 0 : index
    %28 = vector.load %arg5[%c0_11, %c0_12] : memref<8x1xf32, #tpu.memory_space<vmem>>, vector<8x1xf32>
    %29 = vector.broadcast %28 : vector<8x1xf32> to vector<8x128xf32>
    %30 = arith.addf %27, %29 : vector<8x128xf32>
    %cst_13 = arith.constant 0.000000e+00 : f32
    %31 = vector.broadcast %cst_13 : f32 to vector<8x128xf32>
    %32 = arith.maximumf %30, %31 : vector<8x128xf32>
    %33 = vector.extract_strided_slice %1 {offsets = [0, 8], sizes = [4, 128], strides = [1, 1]} : vector<4x136xf32> to vector<4x128xf32>
    %c0_14 = arith.constant 0 : index
    %c0_15 = arith.constant 0 : index
    %34 = vector.load %arg6[%c0_14, %c0_15] : memref<8x4xbf16, #tpu.memory_space<vmem>>, vector<8x4xbf16>
    %35 = arith.truncf %33 : vector<4x128xf32> to vector<4x128xbf16>
    %cst_16 = arith.constant dense<0.000000e+00> : vector<8x128xf32>
    %36 = tpu.matmul %34, %35, %cst_16 {dimension_numbers = #tpu.dot_dimension_numbers<[1], [0], [0], [1], [0, 0, 1, 1], [], []>} : vector<8x4xbf16>, vector<4x128xbf16>, vector<8x128xf32> -> vector<8x128xf32>
    %c0_17 = arith.constant 0 : index
    %c0_18 = arith.constant 0 : index
    %37 = vector.load %arg7[%c0_17, %c0_18] : memref<8x1xf32, #tpu.memory_space<vmem>>, vector<8x1xf32>
    %38 = vector.broadcast %37 : vector<8x1xf32> to vector<8x128xf32>
    %39 = arith.addf %36, %38 : vector<8x128xf32>
    %40 = arith.addf %32, %39 : vector<8x128xf32>
    %cst_19 = arith.constant 0.000000e+00 : f32
    %41 = vector.broadcast %cst_19 : f32 to vector<8x128xf32>
    %42 = arith.maximumf %40, %41 : vector<8x128xf32>
    %c0_20 = arith.constant 0 : index
    %c0_21 = arith.constant 0 : index
    %c0_22 = arith.constant 0 : index
    %43 = vector.load %arg8[%c0_20, %c0_21, %c0_22] : memref<1x8x128xf32, #tpu.memory_space<vmem>>, vector<1x8x128xf32>
    %44 = vector.shape_cast %43 : vector<1x8x128xf32> to vector<8x128xf32>
    %45 = vector.shape_cast %42 : vector<8x128xf32> to vector<1x8x128xf32>
    tpu.vector_store %arg8[%c0_20, %c0_21, %c0_22], %45 {strides = array<i32>} : memref<1x8x128xf32, #tpu.memory_space<vmem>>, vector<1x8x128xf32>,
    return
  }
  func.func @transform_0(%arg0: i32) -> (i32, i32, i32) {
    %c0_i32 = arith.constant 0 : i32
    %c0_i32_0 = arith.constant 0 : i32
    %c0_i32_1 = arith.constant 0 : i32
    return %arg0, %c0_i32, %c0_i32_0 : i32, i32, i32
  }
  func.func @transform_1(%arg0: i32) -> (i32, i32) {
    %c0_i32 = arith.constant 0 : i32
    %c0_i32_0 = arith.constant 0 : i32
    %c0_i32_1 = arith.constant 0 : i32
    return %c0_i32, %c0_i32_0 : i32, i32
  }
  func.func @transform_2(%arg0: i32) -> (i32, i32) {
    %c0_i32 = arith.constant 0 : i32
    %c0_i32_0 = arith.constant 0 : i32
    %c0_i32_1 = arith.constant 0 : i32
    return %c0_i32, %c0_i32_0 : i32, i32
  }
  func.func @transform_3(%arg0: i32) -> (i32, i32) {
    %c0_i32 = arith.constant 0 : i32
    %c0_i32_0 = arith.constant 0 : i32
    %c0_i32_1 = arith.constant 0 : i32
    return %c0_i32, %c0_i32_0 : i32, i32
  }
  func.func @transform_4(%arg0: i32) -> (i32, i32) {
    %c0_i32 = arith.constant 0 : i32
    %c0_i32_0 = arith.constant 0 : i32
    %c0_i32_1 = arith.constant 0 : i32
    return %c0_i32, %c0_i32_0 : i32, i32
  }
  func.func @transform_5(%arg0: i32) -> (i32, i32) {
    %c0_i32 = arith.constant 0 : i32
    %c0_i32_0 = arith.constant 0 : i32
    %c0_i32_1 = arith.constant 0 : i32
    return %c0_i32, %c0_i32_0 : i32, i32
  }
  func.func @transform_6(%arg0: i32) -> (i32, i32) {
    %c0_i32 = arith.constant 0 : i32
    %c0_i32_0 = arith.constant 0 : i32
    %c0_i32_1 = arith.constant 0 : i32
    return %c0_i32, %c0_i32_0 : i32, i32
  }
  func.func @transform_7(%arg0: i32) -> (i32, i32, i32) {
    %c0_i32 = arith.constant 0 : i32
    %c0_i32_0 = arith.constant 0 : i32
    %c0_i32_1 = arith.constant 0 : i32
    return %arg0, %c0_i32, %c0_i32_0 : i32, i32, i32
  }
}

</mosaic_0001>

<bundles_post_ra>
// kernel: tpu_custom_call.1
= control target key start
LH: loop header
LB: loop body
LE: loop exit
PB: predicated region body
PF: predicated region fallthrough
CT: control target
= control target key end

     0   :  { %12 = vsyncpa [#allocation3], 0  ;;  %s846_s0 = inlined_call_operand.vmem [shape: f32[2,4,136], index: 0, kind: input, shape index: {}]   ;;  %s847_s1 = inlined_call_operand.vmem [shape: bf16[8,12], index: 1, kind: input, shape index: {}]   ;;  %s848_s2 = inlined_call_operand.vmem [shape: f32[8,1], index: 2, kind: input, shape index: {}]   ;;  %s849_s3 = inlined_call_operand.vmem [shape: bf16[8,24], index: 3, kind: input, shape index: {}]   ;;  %s850_s4 = inlined_call_operand.vmem [shape: f32[8,1], index: 4, kind: input, shape index: {}]   ;;  %s851_s5 = inlined_call_operand.vmem [shape: bf16[8,4], index: 5, kind: input, shape index: {}]   ;;  %s852_s6 = inlined_call_operand.vmem [shape: f32[8,1], index: 6, kind: input, shape index: {}]   ;;  %s853_s7 = inlined_call_operand.hbm [shape: f32[2,8,128], index: 7, kind: output, shape index: {}]  }
   0x1   :  { %14 = vsyncpa [#allocation3 + $0x1], 0  ;;  %s730_s24 = smov 0   ;;  %s732_s25 = smov 0  }
   0x2   :  { %s734_s26 = smov 0   ;;  %s736_s27 = smov 0  }
   0x3 LB: > { %s751_s28 = sadd.s32 4294967295, %s683_s27   ;;  %s535_s29 = sadd.s32 4294967294, %s683_s27   ;;  %s683_s27 = sphi %s736_s27, %s859_s27   ;;  %s679_s26 = sphi %s734_s26, %s858_s26   ;;  %s675_s25 = sphi %s732_s25, %s857_s25   ;;  %s671_s24 = sphi %s730_s24, %s856_s24  }
   0x4   : > { %s755_s30 = sadd.s32 1, %s683_s27   ;;  %s179_s8 = sadd.s32 1, %s679_s26 }
   0x5   : > { %s176_s9 = ssub.s32 %s683_s27, %s755_s30  ;;  %p189_p0 = scmp.ne.s32.totalorder %s679_s26, %s675_s25 }
   0x6   : > { %p177_p1 = scmp.eq.s32.totalorder %s176_s9, 0  ;;  %p190_p2 = scmp.eq.s32.totalorder %s751_s28, 1 }
   0x7   : > { %p195_p3 = scmp.ne.s32.totalorder %s675_s25, %s671_s24  ;;  %p196_p4 = scmp.eq.s32.totalorder %s535_s29, 1 }
   0x8   : > { %s766_s10 = scalar_select %p177_p1, %s679_s26, %s179_s8  }
   0x9   : > { %p768_p5 = por %p190_p2, %p189_p0  ;;  %p772_p6 = por %p196_p4, %p195_p3 }
   0xa   : > { %p538_p7 = scmp.ge.s32.totalorder %s683_s27, 1  ;;  %p240_p8 = scmp.lt.s32.totalorder %s683_s27, 3 }
   0xc   : > { %p241_p9 = pnand %p538_p7, %p240_p8 }
   0xd   : > { %p272_p10 = scmp.lt.s32.totalorder (!%p241_p9), %s751_s28, 1  ;;  %s685_s18 = smov (!%p241_p9), 126  }
   0xe   : > { %244 = sbr.rel (%p241_p9) target bundleno = 578 (0x242), region = 48  ;;  %s686_s19 = smov (!%p241_p9), 124  }
   0xf   : > { %s688_s29 = smov (!%p241_p9), 120   ;;  %s550_s21 = sshll.u32 (!%p241_p9), %s751_s28, 3 }
  0x13   : > { %s273_s13 = scalar_select %p272_p10, %s751_s28, 1  ;;  %v314_v9 = vld [vmem:[%s848_s2] sm:$0xff]  ;;  %v687_v10 = vmov 0   ;;  %vm293_vm0 = vcmask 1031168   ;;  %vm308_vm1 = vcmask 1043456   ;;  %vm304_vm2 = vcmask 1014784  }
  0x14   : > { %608 = vset.pattern.permute.xlu1 %v687_v10  ;;  %619 = vset.pattern.permute.xlu2 %v687_v10  ;;  %vm324_vm3 = vcmask 1045504   ;;  %v311_v25 = vld [vmem:[%s847_s1] sm:$0xf]  ;;  %vm320_vm4 = vcmask 97280   ;;  %v359_v28 = vlaneseq  ;;  %vm434_vm6 = vcmask 982016  }
  0x15   : > { %s553_s14 = sshll.u32 %s273_s13, 3  ;;  %317 = vperm.xlu1 %608, %v314_v9   ;;  %620 = vset.pattern.permute.xlu0 %v687_v10  ;;  %v387_v43 = vld [vmem:[%s850_s4] sm:$0xff]  ;;  %vm440_vm7 = vcmask 1041408   ;;  %vm436_vm8 = vcmask 31744   ;;  %vm689_vm9 = vmmov 1   ;;  %vm393_vm11 = vcmask 195584  }
  0x16   : > { %s276_s17 = scalar_lea.vmem %s846_s0, %s553_s14  ;;  %v360_v30 = vand.u32 127, %v359_v28  ;;  %v422_v46 = vld [vmem:[%s852_s6] sm:$0xff] }
  0x17   : > { %v278_v0 = vld [vmem:[%s276_s17] sm:$0xff] }
  0x18   : > { %280 = vst [vmem:[#allocation1] ss:$2 sm:$0xff] %v278_v0  ;;  %vm362_vm5 = vcmp.ge.s32.totalorder %v360_v30, 4  ;;  %v414_v50 = vld [vmem:[%s851_s5] sm:$0xf] }
  0x19   : > { %vm544_vm10 = vmpackc.low %vm689_vm9, %vm362_vm5  ;;  %v384_v61 = vld [vmem:[%s849_s3] sm:$0xf] }
  0x1f   : > { %v281_v1 = vld.sshfl [vmem:[#allocation1] sm:$0xff pattern:$0x75316420]  ;;  %v282_v2 = vld.sshfl [vmem:[#allocation1 + $0x8] sm:$0xff pattern:$0x75316420] }
  0x20   : > { %286 = vst [vmem:[#allocation1 + $0x1] ss:$2 sm:$0xff] %v278_v0 }
  0x27   : > { %v287_v3 = vld.sshfl [vmem:[#allocation1] sm:$0xff pattern:$0x75316420]  ;;  %v288_v4 = vld.sshfl [vmem:[#allocation1 + $0x8] sm:$0xff pattern:$0x75316420] }
  0x28   : > { %v598_v5 = vpack.i.bf16 %v288_v4, %v287_v3  ;;  %297 = vst [vmem:[#allocation1] ss:$2 sm:$0xff] %v278_v0 }
  0x2a   : > { %599 = vrot.lane.b32.xlu0 %v598_v5, %s685_s18 }
  0x2f   : > { %v298_v6 = vld.sshfl [vmem:[#allocation1] sm:$0xff pattern:$0x75316420]  ;;  %v299_v7 = vld.sshfl [vmem:[#allocation1 + $0x8] sm:$0xff pattern:$0x75316420] }
  0x30   : > { %v603_v8 = vpack.i.bf16 %v299_v7, %v298_v6  ;;  %415 = vst [vmem:[#allocation1] ss:$2 sm:$0xff] %v278_v0 }
  0x32   : > { %604 = vrot.lane.b32.xlu0 %v603_v8, %s686_s19 }
  0x37   : > { %v417_v26 = vld.sshfl [vmem:[#allocation1 + $0x8] sm:$0xff pattern:$0x75316420]  ;;  %v416_v41 = vld.sshfl [vmem:[#allocation1] sm:$0xff pattern:$0x75316420] }
  0x38   : > { %v421_v27 = vpack.c.bf16 %v417_v26, %v417_v26  ;;  %v420_v42 = vpack.c.bf16 %v416_v41, %v416_v41 }
  0x3a   : > { %432 = vrot.lane.b32.xlu0 %v421_v27, %s688_s29 }
  0x87   : > { %v318_v29 = vpop.permute.xlu1 %317 }
  0x9c   : > { %v600_v11 = vpop.permute.xlu0 %599 }
  0x9d   : > { %v602_v12 = vunpack.i.h.bf16 %v600_v11  ;;  %v601_v13 = vunpack.i.l.bf16 %v600_v11 }
  0x9f   : > { %v294_v15 = vsel %vm293_vm0, %v601_v13, %v602_v12  ;;  %v310_v18 = vsel %vm308_vm1, %v282_v2, %v602_v12 }
  0xa0   : > { %v309_v21 = vsel %vm308_vm1, %v281_v1, %v294_v15 }
  0xa4   : > { %v605_v14 = vpop.permute.xlu0 %604 }
  0xa5   : > { %v607_v16 = vunpack.i.h.bf16 %v605_v14  ;;  %v606_v17 = vunpack.i.l.bf16 %v605_v14 }
  0xa7   : > { %v313_v19 = vpack.c.bf16 %v607_v16, %v310_v18  ;;  %v305_v20 = vsel %vm304_vm2, %v606_v17, %v607_v16 }
  0xa8   : > { %v312_v22 = vpack.c.bf16 %v305_v20, %v309_v21 }
  0xa9   : > { %v329_v23 = vsel %vm324_vm3, %v313_v19, 0 }
  0xaa   : > { %351 = vmatpush.bf16.msra.mxu1 %v329_v23  ;;  %v326_v24 = vsel %vm324_vm3, %v312_v22, 0 }
  0xab   : > { %338 = vmatpush.bf16.msra.mxu0 %v326_v24 }
  0xac   : > { %v433_v45 = vpop.permute.xlu0 %432 }
  0xad   : > { %543 = vmatmul.msk.bf16.vlgmr.msra.gmra.mxu1 %vm320_vm4, %v311_v25 }
  0xae   : > { %542 = vmatmul.msk.bf16.vlgmr.msra.gmra.mxu0 %vm320_vm4, %v311_v25 }
 0x12a   : > { %v353_v31 = vpop.f32.mrf.mxu1 }
 0x12b   : > { %v354_v32 = vadd.f32 %v353_v31, %v318_v29  ;;  %v340_v33 = vpop.f32.mrf.mxu0 }
 0x12c   : > { %v341_v34 = vadd.f32 %v340_v33, %v318_v29 }
 0x12d   : > { %v358_v35 = vmax.f32 %v354_v32, 0.0 }
 0x12e   : > { %v357_v36 = vmax.f32 %v341_v34, 0.0 }
 0x130   : > { %v368_v37 = vsel %vm362_vm5, %v357_v36, 0.0 }
 0x131   : > { %v614_v38 = vpack.i.bf16 %v358_v35, %v368_v37 }
 0x132   : > { %v355_v39 = vpop.f32.mrf.mxu1 }
 0x133   : > { %v342_v40 = vpop.f32.mrf.mxu0  ;;  %615 = vrot.lane.b32.xlu2 %v614_v38, %s685_s18  ;;  %610 = vrot.lane.b32.xlu1 %v614_v38, %s686_s19  ;;  %s269_s19 = sand.u32 1, %s675_s25   ;;  %s641_s18 = scalar_lea.hbm %s853_s7, 16 }
 0x134   : > { %s539_s20 = sshll.u32 %s269_s19, 3  ;;  %s461_s28 = scalar_lea.sflag [#allocation3], %s269_s19 }
 0x135   : > { %s271_s8 = scalar_lea.vmem [#allocation2], %s539_s20 }
 0x136   : > { %s473_s9 = sshll.u32 %s271_s8, 4  ;;  %s474_s9 = int_to_ptr.vmem [resolvable:$true] %s473_s9 }
 0x13b   : > { %390 = vperm.xlu1 %608, %v387_v43   ;;  %430 = vrot.lane.b32.xlu2 %v420_v42, %s688_s29  ;;  %s471_s29 = scalar_lea.hbm %s853_s7, %s550_s21 }
 0x13c   : > { %s475_s13 = sshll.u32 %s471_s29, 4  ;;  %s476_s13 = int_to_ptr.hbm [resolvable:$true] %s475_s13 }
 0x13d   : > { %s635_s14 = sshra.s32 %s476_s13, 4  ;;  %s636_s14 = int_to_ptr.hbm [resolvable:$true] %s635_s14 }
 0x13e   : > { %s637_s15 = scalar_lea.hbm %s636_s14, 8  ;;  %p642_p0 = scmp.lt.s32.totalorder %s636_s14, %s853_s7 }
 0x13f   : > { %p638_p11 = scmp.ne.s32.totalorder %s636_s14, %s637_s15  ;;  %p643_p1 = scmp.lt.s32.totalorder %s641_s18, %s637_s15 }
 0x141   : > { %p639_p12 = pnand %p638_p11, %p768_p5  ;;  %p644_p2 = por %p643_p1, %p642_p0 }
 0x143   : > { %425 = vperm.xlu2 %619, %v422_v46   ;;  %p640_p13 = pneg %p639_p12 }
 0x145   : > { %p645_p3 = pnand %p644_p2, %p640_p13 }
 0x18d   : > { %v616_v44 = vpop.permute.xlu2 %615 }
 0x18e   : > { %v618_v54 = vunpack.i.h.bf16 %v616_v44  ;;  %v617_v55 = vunpack.i.l.bf16 %v616_v44 }
 0x190   : > { %v376_v59 = vsel %vm293_vm0, %v617_v55, %v618_v54 }
 0x191   : > { %v545_v60 = vpack.c.bf16 %v376_v59, %v357_v36 }
 0x195   : > { %v431_v47 = vpop.permute.xlu2 %430 }
 0x196   : > { %v435_v48 = vsel %vm434_vm6, %v431_v47, %v433_v45 }
 0x197   : > { %v442_v49 = vsel %vm440_vm7, %v435_v48, 0 }
 0x198   : > { %451 = vmatpush.bf16.msra.mxu3 %v442_v49 }
 0x19b   : > { %548 = vmatmul.msk.bf16.vlgmr.msra.gmra.mxu3 %vm436_vm8, %v414_v50 }
 0x19d   : > { %v426_v0 = vpop.permute.xlu2 %425 }
 0x1a5   : > { %v611_v51 = vpop.permute.xlu1 %610 }
 0x1a6   : > { %v613_v52 = vunpack.i.h.bf16 %v611_v51  ;;  %v612_v53 = vunpack.i.l.bf16 %v611_v51 }
 0x1a8   : > { %v382_v56 = vsel %vm304_vm2, %v612_v53, %v613_v52 }
 0x1a9   : > { %v386_v57 = vpack.c.bf16 %v382_v56, %v382_v56 }
 0x1ab   : > { %v398_v58 = vsel %vm308_vm1, %v386_v57, 0 }
 0x1ac   : > { %406 = vmatpush.bf16.msra.mxu2 %v398_v58 }
 0x1ad   : > { %v391_v1 = vpop.permute.xlu1 %390 }
 0x1b0   : > { %546 = vmatpush.bf16.msk.msra.mxu2 %vm544_vm10, %v545_v60 }
 0x1b3   : > { %547 = vmatmul.msk.bf16.vlgmr.msra.gmra.mxu2 %vm393_vm11, %v384_v61 }
 0x21e   : > { %v453_v62 = vpop.f32.mrf.mxu3 }
 0x21f   : > { %v454_v4 = vadd.f32 %v453_v62, %v426_v0 }
 0x226   : > { %v455_v63 = vpop.f32.mrf.mxu3 }
 0x236   : > { %v409_v2 = vpop.f32.mrf.mxu2 }
 0x237   : > { %v410_v3 = vadd.f32 %v409_v2, %v391_v1 }
 0x239   : > { %v413_v5 = vmax.f32 %v410_v3, 0.0 }
 0x23b   : > { %v457_v6 = vadd.f32 %v454_v4, %v413_v5 }
 0x23d   : > { %v458_v7 = vmax.f32 %v457_v6, 0.0 }
 0x23e   : > { %v411_v8 = vpop.f32.mrf.mxu2 }
 0x23f   : > { %459 = vst [vmem:[%s271_s8] sm:$0xff] %v458_v7 }
 0x240   : > { %648 = shalt.err (!%p645_p3)
}
 0x241   : > { %554 = dma.vmem_to_hbm [thread:$0]  (%p768_p5), %s474_s9, 128, %s476_s13, %s461_s28  }
 0x242 PF: > { %p560_p4 = scmp.ge.s32.totalorder %s683_s27, 2  ;;  %s487_s19 = sand.u32 1, %s671_s24  }
 0x243   : > { %s488_s22 = scalar_lea.sflag [#allocation3], %s487_s19 }
 0x244   : > { %p557_p7 = pnand %p560_p4, %p772_p6 }
 0x246   : > { %p558_p8 = pneg %p557_p7 }
 0x248   : > { %666 = dma.done.wait (%p558_p8), %s488_s22, 128  }
 0x249   : > { %668 = vsyncadd (%p558_p8), %s488_s22, 4294967168  ;;  %p17_p9 = scmp.ge.s32.totalorder %s755_s30, 4   ;;  %s856_s24 = smov %s675_s25 }
 0x24a   : > { %s857_s25 = smov %s679_s26  ;;  %s858_s26 = smov %s766_s10 }
 0x24b   : > { %s859_s27 = smov %s755_s30  ;;  %19 = sbr.rel (!%p17_p9) target bundleno = 3 (0x3), region = 84 }
 0x250   :  { %494 = vsyncpa [#allocation3], 1 }
 0x251   :  { %496 = vsyncpa [#allocation3 + $0x1], 1 }

</bundles_post_ra>
